<compile_context>
chip_gen: v7x
topology: tpu7x:2x2x1
jax: 0.10.0
libtpu: 0.0.40
codegen_flags: <defaults>
</compile_context>

<pallas_src>
import functools

import jax
import jax.numpy as jnp
import numpy as np
from jax.experimental import pallas as pl
from jax.experimental.pallas import tpu as pltpu


def _round_up(v: int, m: int) -> int:
    return (v + m - 1) // m * m


def _gelu_exact(h):
    """Exact GELU (matches torch.nn.GELU default, approximate='none').

    erf via Abramowitz & Stegun 7.1.26 (max abs error ~1.5e-7 ~ f32 eps), built only
    from ops guaranteed to lower on Mosaic.  The sign is folded into
    0.5*(h + |h| * erf(|h|/sqrt(2))), removing the select of the previous version.
    """
    ah = jnp.abs(h)
    az = ah * 0.7071067811865476                       # |h| / sqrt(2)
    t = 1.0 / (1.0 + 0.3275911 * az)
    poly = t * (0.254829592
                + t * (-0.284496736
                       + t * (1.421413741
                              + t * (-1.453152027
                                     + t * 1.061405429))))
    e = 1.0 - poly * jnp.exp(-az * az)                 # erf(|h| / sqrt(2))
    return 0.5 * (h + ah * e)


def projection_kernel(x_ref, wp_ref, wm_ref, params_ref, out_ref, h_acc,
                      *, eps, inv_latent):
    """One row tile: projection -> GELU -> MLP linear -> residual -> LayerNorm.

    Grid = (row_tiles, k_tiles).  The k axis splits the embedding (contraction) dim of
    the first matmul; h is accumulated into a f32 VMEM scratch and the remainder of the
    network runs once, on the last k step.
    """
    k = pl.program_id(1)

    @pl.when(k == 0)
    def _():
        h_acc[...] = jnp.zeros_like(h_acc)

    # h += x @ Wp^T  (weights pre-transposed in the wrapper; no in-kernel .T)
    h_acc[...] += jnp.dot(x_ref[...], wp_ref[...],
                          preferred_element_type=jnp.float32)

    @pl.when(k == pl.num_programs(1) - 1)
    def _():
        p = params_ref[...]                            # (4, Lp) f32: bp | bm | gamma | beta
        h = h_acc[...] + p[0:1]                        # (TM, Lp) f32

        g = _gelu_exact(h)
        # NOTE: casting the GELU activations to the weight dtype keeps the MXU at full
        # rate for bf16 weights; with bf16 this drifts slightly from the f32 reference.
        m = jnp.dot(g.astype(wm_ref.dtype), wm_ref[...],
                    preferred_element_type=jnp.float32) + p[1:2]

        y = m + h                                      # residual

        # LayerNorm: one-pass sums divided by the TRUE latent dim, so zero-padded lanes
        # (latent dim padded to a multiple of 128) do not perturb the statistics.
        mean = jnp.sum(y, axis=-1, keepdims=True) * inv_latent
        msq = jnp.sum(y * y, axis=-1, keepdims=True) * inv_latent
        var = jnp.maximum(msq - mean * mean, 0.0)
        yn = (y - mean) * jax.lax.rsqrt(var + eps)
        out_ref[...] = (yn * p[2:3] + p[3:4]).astype(out_ref.dtype)


def _vmem_hard_cap_bytes() -> int:
    """~3/4 of physical VMEM, capped at 100 MiB (v5e/v6e: ~96 MiB, v7x: ~48 MiB)."""
    cap = 128 * 1024 * 1024
    try:
        cap = int(getattr(pltpu.get_tpu_info(), "vmem_capacity_bytes", cap))
    except Exception:
        pass
    return min(100 * 1024 * 1024, (cap * 3) // 4)


def _single_buffered():
    """pl.Buffered(1) if this JAX exposes it (constant blocks need no double buffer)."""
    buffered = getattr(pl, "Buffered", None)
    return buffered(1) if buffered is not None else None


def projection_forward(x, w_proj, b_proj, w_mlp, b_mlp, ln_w, ln_b,
                       *, eps=1e-5, block_rows=256):
    """x: (..., E). w_proj: (L, E). w_mlp: (L, L). Returns (..., L)."""
    *lead, E = x.shape
    L = w_proj.shape[0]
    M = int(np.prod(lead)) if lead else 1
    x2 = x.reshape(M, E)

    x_isz = x.dtype.itemsize
    w_isz = jnp.asarray(w_proj).dtype.itemsize

    # Lane-pad the latent dim to a multiple of 128: lane-dense stores and MXU-friendly N
    # for both matmuls.  Zero padding keeps the math exact (see LayerNorm in the kernel).
    Lp = max(128, _round_up(L, 128))
    wp_t = jnp.asarray(w_proj).T                       # (E, L)
    wm_t = jnp.asarray(w_mlp).T                        # (L, L)
    params = jnp.stack([jnp.asarray(b_proj), jnp.asarray(b_mlp),
                        jnp.asarray(ln_w), jnp.asarray(ln_b)]).astype(jnp.float32)
    if Lp != L:
        wp_t = jnp.pad(wp_t, ((0, 0), (0, Lp - L)))
        wm_t = jnp.pad(wm_t, ((0, Lp - L), (0, Lp - L)))
        params = jnp.pad(params, ((0, 0), (0, Lp - L)))

    budget = _vmem_hard_cap_bytes()

    # Optional K-split of the embedding dim: only when the (E, Lp) projection weight slab
    # alone would eat a large share of the VMEM budget.  tk stays a power-of-two divisor
    # of E and a multiple of 128 (x's lane dim), so no contraction lanes are ragged.
    tk = E
    while tk % 2 == 0 and tk // 2 >= 128 and tk * Lp * w_isz > budget // 3:
        tk //= 2
    nk = E // tk

    # Row tile: dtype-aligned sublane multiple, at least 2 grid steps when possible
    # (v7x megacore), shrunk until the VMEM footprint fits the budget.
    sub = {4: 8, 2: 16, 1: 32}.get(x_isz, 8)
    tm = _round_up(max(1, min(block_rows, M)), sub)
    if M > sub:
        tm = min(tm, _round_up(pl.cdiv(M, 2), sub))
    tm = max(tm, sub)

    def footprint(tm_):
        x_buf = 2 * tm_ * tk * x_isz                   # double-buffered input tile
        wp_buf = (2 if nk > 1 else 1) * tk * Lp * w_isz
        wm_buf = Lp * Lp * w_isz                       # single-buffered (resident)
        p_buf = 8 * Lp * 4                             # (4, Lp) padded to 8 sublanes
        o_buf = 2 * tm_ * Lp * x_isz                   # double-buffered output tile
        acc = tm_ * Lp * 4                             # h accumulator scratch
        tmp = 4 * tm_ * Lp * 4                         # live f32 intermediates
        return x_buf + wp_buf + wm_buf + p_buf + o_buf + acc + tmp

    while tm > sub and footprint(tm) > budget:
        tm = max(sub, _round_up(tm // 2, sub))

    grid = (pl.cdiv(M, tm), nk)
    single = _single_buffered()
    wp_mode = single if nk == 1 else None              # K-split -> keep double buffering

    vmem_limit = int(min(budget, max(footprint(tm) + (8 << 20), 16 << 20)))

    cost = pl.CostEstimate(
        flops=int(2 * M * E * Lp + 2 * M * Lp * Lp + 30 * M * Lp),
        transcendentals=int(M * Lp + M),               # exp in the GELU erf + row rsqrt
        bytes_accessed=int(M * E * x_isz + M * Lp * x_isz
                           + (E * Lp + Lp * Lp) * w_isz + 4 * Lp * 4),
    )

    kernel = functools.partial(projection_kernel, eps=float(eps),
                               inv_latent=1.0 / float(L))

    out = pl.pallas_call(
        kernel,
        out_shape=jax.ShapeDtypeStruct((M, Lp), x.dtype),
        grid_spec=pltpu.PrefetchScalarGridSpec(
            num_scalar_prefetch=0,
            grid=grid,
            in_specs=[
                pl.BlockSpec((tm, tk), lambda i, k: (i, k)),            # x row tile
                pl.BlockSpec((tk, Lp), lambda i, k: (k, 0),
                             pipeline_mode=wp_mode),                    # Wp^T
                pl.BlockSpec((Lp, Lp), lambda i, k: (0, 0),
                             pipeline_mode=single),                     # Wm^T (resident)
                pl.BlockSpec((4, Lp), lambda i, k: (0, 0),
                             pipeline_mode=single),                     # bp|bm|gamma|beta
            ],
            out_specs=pl.BlockSpec((tm, Lp), lambda i, k: (i, 0)),
            scratch_shapes=[pltpu.VMEM((tm, Lp), jnp.float32)],
        ),
        compiler_params=pltpu.CompilerParams(
            dimension_semantics=("parallel", "arbitrary"),
            vmem_limit_bytes=vmem_limit,
        ),
        cost_estimate=cost,
    )(x2, wp_t, wm_t, params)

    out = out[:, :L] if Lp != L else out
    return out.reshape(*lead, L)


def projection_reference(x, w_proj, b_proj, w_mlp, b_mlp, ln_w, ln_b, eps=1e-5):
    """Pure-JAX reference mirroring the PyTorch module exactly."""
    h = jnp.einsum('...e,le->...l', x, w_proj) + b_proj
    m = jax.nn.gelu(h, approximate=False)              # nn.GELU default (erf)
    m = jnp.einsum('...k,lk->...l', m, w_mlp) + b_mlp
    y = m + h
    mean = jnp.mean(y, axis=-1, keepdims=True)
    var = jnp.mean((y - mean) ** 2, axis=-1, keepdims=True)
    return (y - mean) / jnp.sqrt(var + eps) * ln_w + ln_b


if __name__ == "__main__":
    B, N, E, L = 2, 8, 32, 64

    key = jax.random.PRNGKey(0)
    kx, kwp, kbp, kwm, kbm, kg, kb = jax.random.split(key, 7)

    # PyTorch nn.Linear default init: U(-1/sqrt(fan_in), 1/sqrt(fan_in)).
    bound_p = 1.0 / np.sqrt(E)
    bound_m = 1.0 / np.sqrt(L)
    x = jax.random.normal(kx, (B, N, E), dtype=jnp.float32)
    w_proj = jax.random.uniform(kwp, (L, E), jnp.float32, -bound_p, bound_p)
    b_proj = jax.random.uniform(kbp, (L,), jnp.float32, -bound_p, bound_p)
    w_mlp = jax.random.uniform(kwm, (L, L), jnp.float32, -bound_m, bound_m)
    b_mlp = jax.random.uniform(kbm, (L,), jnp.float32, -bound_m, bound_m)
    # Non-trivial LayerNorm affine so the gamma/beta path is actually exercised.
    ln_w = 1.0 + 0.1 * jax.random.normal(kg, (L,), dtype=jnp.float32)
    ln_b = 0.1 * jax.random.normal(kb, (L,), dtype=jnp.float32)

    out = projection_forward(x, w_proj, b_proj, w_mlp, b_mlp, ln_w, ln_b)
    out = jax.block_until_ready(out)

    ref = projection_reference(x, w_proj, b_proj, w_mlp, b_mlp, ln_w, ln_b)
    np.testing.assert_allclose(np.asarray(out), np.asarray(ref),
                               atol=3e-5, rtol=3e-5)

    print("KERNEL_OK")
</pallas_src>

<mosaic_0001>
module attributes {stable_mosaic.version = 11 : i64} {
  func.func @projection_kernel(%arg0: i32, %arg1: i32, %arg2: memref<8x32xf32, #tpu.memory_space<vmem>>, %arg3: memref<32x128xf32, #tpu.memory_space<vmem>>, %arg4: memref<128x128xf32, #tpu.memory_space<vmem>>, %arg5: memref<4x128xf32, #tpu.memory_space<vmem>>, %arg6: memref<8x128xf32, #tpu.memory_space<vmem>>, %arg7: memref<8x128xf32, #tpu.memory_space<vmem>>) attributes {dimension_semantics = [#tpu.dimension_semantics<parallel>, #tpu.dimension_semantics<arbitrary>], iteration_bounds = array<i64: 2, 1>, scalar_prefetch = 0 : i64, scratch_operands = 1 : i64, tpu.core_type = #tpu.core_type<tc>, window_params = [{transform_indices = @transform_0, window_bounds = array<i64: 8, 32>}, {pipeline_mode = #tpu.pipeline_mode<synchronous>, transform_indices = @transform_1, window_bounds = array<i64: 32, 128>}, {pipeline_mode = #tpu.pipeline_mode<synchronous>, transform_indices = @transform_2, window_bounds = array<i64: 128, 128>}, {pipeline_mode = #tpu.pipeline_mode<synchronous>, transform_indices = @transform_3, window_bounds = array<i64: 4, 128>}, {transform_indices = @transform_4, window_bounds = array<i64: 8, 128>}]} {
    %c0_i32 = arith.constant 0 : i32
    %0 = arith.cmpi eq, %arg1, %c0_i32 : i32
    %1 = arith.extui %0 : i1 to i32
    %c0_i32_0 = arith.constant 0 : i32
    %2 = arith.cmpi ne, %1, %c0_i32_0 : i32
    scf.if %2 {
      %cst_10 = arith.constant 0.000000e+00 : f32
      %12 = vector.broadcast %cst_10 : f32 to vector<8x128xf32>
      %c0_11 = arith.constant 0 : index
      %c0_12 = arith.constant 0 : index
      %13 = vector.load %arg7[%c0_11, %c0_12] : memref<8x128xf32, #tpu.memory_space<vmem>>, vector<8x128xf32>
      tpu.vector_store %arg7[%c0_11, %c0_12], %12 {strides = array<i32>} : memref<8x128xf32, #tpu.memory_space<vmem>>, vector<8x128xf32>,
    } else {
    }
    %c0 = arith.constant 0 : index
    %c0_1 = arith.constant 0 : index
    %3 = vector.load %arg7[%c0, %c0_1] : memref<8x128xf32, #tpu.memory_space<vmem>>, vector<8x128xf32>
    %c0_2 = arith.constant 0 : index
    %c0_3 = arith.constant 0 : index
    %4 = vector.load %arg2[%c0_2, %c0_3] : memref<8x32xf32, #tpu.memory_space<vmem>>, vector<8x32xf32>
    %c0_4 = arith.constant 0 : index
    %c0_5 = arith.constant 0 : index
    %5 = vector.load %arg3[%c0_4, %c0_5] : memref<32x128xf32, #tpu.memory_space<vmem>>, vector<32x128xf32>
    %cst = arith.constant dense<0.000000e+00> : vector<8x128xf32>
    %6 = tpu.matmul %4, %5, %cst {dimension_numbers = #tpu.dot_dimension_numbers<[1], [0], [0], [1], [0, 0, 1, 1], [], []>} : vector<8x32xf32>, vector<32x128xf32>, vector<8x128xf32> -> vector<8x128xf32>
    %7 = arith.addf %3, %6 : vector<8x128xf32>
    %c0_6 = arith.constant 0 : index
    %c0_7 = arith.constant 0 : index
    %8 = vector.load %arg7[%c0_6, %c0_7] : memref<8x128xf32, #tpu.memory_space<vmem>>, vector<8x128xf32>
    tpu.vector_store %arg7[%c0_6, %c0_7], %7 {strides = array<i32>} : memref<8x128xf32, #tpu.memory_space<vmem>>, vector<8x128xf32>,
    %c0_i32_8 = arith.constant 0 : i32
    %9 = arith.cmpi eq, %arg1, %c0_i32_8 : i32
    %10 = arith.extui %9 : i1 to i32
    %c0_i32_9 = arith.constant 0 : i32
    %11 = arith.cmpi ne, %10, %c0_i32_9 : i32
    scf.if %11 {
      %c0_10 = arith.constant 0 : index
      %c0_11 = arith.constant 0 : index
      %12 = vector.load %arg5[%c0_10, %c0_11] : memref<4x128xf32, #tpu.memory_space<vmem>>, vector<4x128xf32>
      %c0_12 = arith.constant 0 : index
      %c0_13 = arith.constant 0 : index
      %13 = vector.load %arg7[%c0_12, %c0_13] : memref<8x128xf32, #tpu.memory_space<vmem>>, vector<8x128xf32>
      %14 = vector.extract_strided_slice %12 {offsets = [0, 0], sizes = [1, 128], strides = [1, 1]} : vector<4x128xf32> to vector<1x128xf32>
      %15 = vector.broadcast %14 : vector<1x128xf32> to vector<8x128xf32>
      %16 = arith.addf %13, %15 : vector<8x128xf32>
      %17 = math.absf %16 : vector<8x128xf32>
      %cst_14 = arith.constant 0.707106769 : f32
      %18 = vector.broadcast %cst_14 : f32 to vector<8x128xf32>
      %19 = arith.mulf %17, %18 : vector<8x128xf32>
      %cst_15 = arith.constant 0.327591091 : f32
      %20 = vector.broadcast %cst_15 : f32 to vector<8x128xf32>
      %21 = arith.mulf %20, %19 : vector<8x128xf32>
      %cst_16 = arith.constant 1.000000e+00 : f32
      %22 = vector.broadcast %cst_16 : f32 to vector<8x128xf32>
      %23 = arith.addf %22, %21 : vector<8x128xf32>
      %cst_17 = arith.constant 1.000000e+00 : f32
      %24 = vector.broadcast %cst_17 : f32 to vector<8x128xf32>
      %25 = arith.divf %24, %23 : vector<8x128xf32>
      %cst_18 = arith.constant 1.06140542 : f32
      %26 = vector.broadcast %cst_18 : f32 to vector<8x128xf32>
      %27 = arith.mulf %25, %26 : vector<8x128xf32>
      %cst_19 = arith.constant -1.45315206 : f32
      %28 = vector.broadcast %cst_19 : f32 to vector<8x128xf32>
      %29 = arith.addf %28, %27 : vector<8x128xf32>
      %30 = arith.mulf %25, %29 : vector<8x128xf32>
      %cst_20 = arith.constant 1.42141378 : f32
      %31 = vector.broadcast %cst_20 : f32 to vector<8x128xf32>
      %32 = arith.addf %31, %30 : vector<8x128xf32>
      %33 = arith.mulf %25, %32 : vector<8x128xf32>
      %cst_21 = arith.constant -0.284496725 : f32
      %34 = vector.broadcast %cst_21 : f32 to vector<8x128xf32>
      %35 = arith.addf %34, %33 : vector<8x128xf32>
      %36 = arith.mulf %25, %35 : vector<8x128xf32>
      %cst_22 = arith.constant 0.254829586 : f32
      %37 = vector.broadcast %cst_22 : f32 to vector<8x128xf32>
      %38 = arith.addf %37, %36 : vector<8x128xf32>
      %39 = arith.mulf %25, %38 : vector<8x128xf32>
      %cst_23 = arith.constant 0.000000e+00 : f32
      %40 = vector.broadcast %cst_23 : f32 to vector<8x128xf32>
      %41 = arith.subf %40, %19 : vector<8x128xf32>
      %42 = arith.mulf %41, %19 : vector<8x128xf32>
      %43 = math.exp %42 : vector<8x128xf32>
      %44 = arith.mulf %39, %43 : vector<8x128xf32>
      %cst_24 = arith.constant 1.000000e+00 : f32
      %45 = vector.broadcast %cst_24 : f32 to vector<8x128xf32>
      %46 = arith.subf %45, %44 : vector<8x128xf32>
      %47 = arith.mulf %17, %46 : vector<8x128xf32>
      %48 = arith.addf %16, %47 : vector<8x128xf32>
      %cst_25 = arith.constant 5.000000e-01 : f32
      %49 = vector.broadcast %cst_25 : f32 to vector<8x128xf32>
      %50 = arith.mulf %49, %48 : vector<8x128xf32>
      %c0_26 = arith.constant 0 : index
      %c0_27 = arith.constant 0 : index
      %51 = vector.load %arg4[%c0_26, %c0_27] : memref<128x128xf32, #tpu.memory_space<vmem>>, vector<128x128xf32>
      %cst_28 = arith.constant dense<0.000000e+00> : vector<8x128xf32>
      %52 = tpu.matmul %50, %51, %cst_28 {dimension_numbers = #tpu.dot_dimension_numbers<[1], [0], [0], [1], [0, 0, 1, 1], [], []>} : vector<8x128xf32>, vector<128x128xf32>, vector<8x128xf32> -> vector<8x128xf32>
      %53 = vector.extract_strided_slice %12 {offsets = [1, 0], sizes = [1, 128], strides = [1, 1]} : vector<4x128xf32> to vector<1x128xf32>
      %54 = vector.broadcast %53 : vector<1x128xf32> to vector<8x128xf32>
      %55 = arith.addf %52, %54 : vector<8x128xf32>
      %56 = arith.addf %55, %16 : vector<8x128xf32>
      %cst_29 = arith.constant dense<0.000000e+00> : vector<8xf32>
      %57 = vector.multi_reduction <add>, %56, %cst_29 [1] : vector<8x128xf32> to vector<8xf32>
      %58 = vector.shape_cast %57 : vector<8xf32> to vector<8x1xf32>
      %cst_30 = arith.constant 1.562500e-02 : f32
      %59 = vector.broadcast %cst_30 : f32 to vector<8x1xf32>
      %60 = arith.mulf %58, %59 : vector<8x1xf32>
      %61 = arith.mulf %56, %56 : vector<8x128xf32>
      %cst_31 = arith.constant dense<0.000000e+00> : vector<8xf32>
      %62 = vector.multi_reduction <add>, %61, %cst_31 [1] : vector<8x128xf32> to vector<8xf32>
      %63 = vector.shape_cast %62 : vector<8xf32> to vector<8x1xf32>
      %cst_32 = arith.constant 1.562500e-02 : f32
      %64 = vector.broadcast %cst_32 : f32 to vector<8x1xf32>
      %65 = arith.mulf %63, %64 : vector<8x1xf32>
      %66 = arith.mulf %60, %60 : vector<8x1xf32>
      %67 = arith.subf %65, %66 : vector<8x1xf32>
      %cst_33 = arith.constant 0.000000e+00 : f32
      %68 = vector.broadcast %cst_33 : f32 to vector<8x1xf32>
      %69 = arith.maximumf %67, %68 : vector<8x1xf32>
      %70 = vector.broadcast %60 : vector<8x1xf32> to vector<8x128xf32>
      %71 = arith.subf %56, %70 : vector<8x128xf32>
      %cst_34 = arith.constant 9.99999974E-6 : f32
      %72 = vector.broadcast %cst_34 : f32 to vector<8x1xf32>
      %73 = arith.addf %69, %72 : vector<8x1xf32>
      %74 = math.rsqrt %73 : vector<8x1xf32>
      %75 = vector.broadcast %74 : vector<8x1xf32> to vector<8x128xf32>
      %76 = arith.mulf %71, %75 : vector<8x128xf32>
      %77 = vector.extract_strided_slice %12 {offsets = [2, 0], sizes = [1, 128], strides = [1, 1]} : vector<4x128xf32> to vector<1x128xf32>
      %78 = vector.broadcast %77 : vector<1x128xf32> to vector<8x128xf32>
      %79 = arith.mulf %76, %78 : vector<8x128xf32>
      %80 = vector.extract_strided_slice %12 {offsets = [3, 0], sizes = [1, 128], strides = [1, 1]} : vector<4x128xf32> to vector<1x128xf32>
      %81 = vector.broadcast %80 : vector<1x128xf32> to vector<8x128xf32>
      %82 = arith.addf %79, %81 : vector<8x128xf32>
      %c0_35 = arith.constant 0 : index
      %c0_36 = arith.constant 0 : index
      %83 = vector.load %arg6[%c0_35, %c0_36] : memref<8x128xf32, #tpu.memory_space<vmem>>, vector<8x128xf32>
      tpu.vector_store %arg6[%c0_35, %c0_36], %82 {strides = array<i32>} : memref<8x128xf32, #tpu.memory_space<vmem>>, vector<8x128xf32>,
    } else {
    }
    return
  }
  func.func @transform_0(%arg0: i32, %arg1: i32) -> (i32, i32) {
    %c0_i32 = arith.constant 0 : i32
    return %arg0, %arg1 : i32, i32
  }
  func.func @transform_1(%arg0: i32, %arg1: i32) -> (i32, i32) {
    %c0_i32 = arith.constant 0 : i32
    %c0_i32_0 = arith.constant 0 : i32
    return %arg1, %c0_i32 : i32, i32
  }
  func.func @transform_2(%arg0: i32, %arg1: i32) -> (i32, i32) {
    %c0_i32 = arith.constant 0 : i32
    %c0_i32_0 = arith.constant 0 : i32
    %c0_i32_1 = arith.constant 0 : i32
    return %c0_i32, %c0_i32_0 : i32, i32
  }
  func.func @transform_3(%arg0: i32, %arg1: i32) -> (i32, i32) {
    %c0_i32 = arith.constant 0 : i32
    %c0_i32_0 = arith.constant 0 : i32
    %c0_i32_1 = arith.constant 0 : i32
    return %c0_i32, %c0_i32_0 : i32, i32
  }
  func.func @transform_4(%arg0: i32, %arg1: i32) -> (i32, i32) {
    %c0_i32 = arith.constant 0 : i32
    %c0_i32_0 = arith.constant 0 : i32
    return %arg0, %c0_i32 : i32, i32
  }
}

</mosaic_0001>

<bundles_post_ra>
// kernel: tpu_custom_call.1
= control target key start
LH: loop header
LB: loop body
LE: loop exit
PB: predicated region body
PF: predicated region fallthrough
CT: control target
= control target key end

     0   :  { %9 = vsyncpa [#allocation4], 0  ;;  %s1308_s0 = inlined_call_operand.hbm [shape: f32[16,32], index: 0, kind: input, shape index: {}]   ;;  %s1309_s1 = inlined_call_operand.hbm [shape: f32[32,128], index: 1, kind: input, shape index: {}]   ;;  %s1310_s2 = inlined_call_operand.hbm [shape: f32[128,128], index: 2, kind: input, shape index: {}]   ;;  %s1311_s3 = inlined_call_operand.vmem [shape: f32[4,128], index: 3, kind: input, shape index: {}]   ;;  %s1312_s4 = inlined_call_operand.hbm [shape: f32[16,128], index: 4, kind: output, shape index: {}]  }
   0x1   :  { %11 = vsyncpa [#allocation4 + $0x1], 0 }
   0x2   :  { %12 = vsyncpa [#allocation7], 0 }
   0x3   :  { %13 = vsyncpa [#allocation5], 0 }
   0x4   :  { %15 = vsyncpa [#allocation5 + $0x1], 0  ;;  %s1035_s15 = smov 0   ;;  %s1037_s16 = smov 0  }
   0x5   :  { %s1039_s17 = smov 0   ;;  %s1041_s18 = smov 0  }
   0x6   :  { %s1043_s19 = smov 0   ;;  %s1045_s20 = smov 0  }
   0x7 LB: > { %s617_s21 = sadd.s32 4294967295, %s999_s20   ;;  %s618_s22 = sadd.s32 4294967294, %s999_s20   ;;  %s999_s20 = sphi %s1045_s20, %s21_s20   ;;  %s995_s19 = sphi %s1043_s19, %s1334_s19   ;;  %s991_s18 = sphi %s1041_s18, %s1333_s18   ;;  %s987_s17 = sphi %s1039_s17, %s1332_s17   ;;  %s983_s16 = sphi %s1037_s16, %s1331_s16   ;;  %s979_s15 = sphi %s1035_s15, %s1330_s15  }
   0x8   : > { %p55_p0 = scmp.ne.s32.totalorder %s983_s16, %s979_s15  ;;  %p1069_p1 = scmp.eq.s32.totalorder %s617_s21, 0 }
   0x9   : > { %p1073_p2 = scmp.eq.s32.totalorder %s617_s21, 1  ;;  %p153_p3 = scmp.eq.s32.totalorder %s618_s22, 1 }
   0xa   : > { %s1317_s23 = scalar_select %p1069_p1, 1, 0 }
   0xb   : > { %p1079_p4 = por %p1069_p1, %p55_p0  ;;  %p619_p5 = scmp.ge.s32.totalorder %s999_s20, 1 }
   0xc   : > { %p1084_p6 = por %p153_p3, %p55_p0  ;;  %p160_p7 = scmp.lt.s32.totalorder %s999_s20, 3 }
   0xd   : > { %s1319_s25 = scalar_select %p1079_p4, 1, 0 }
   0xe   : > { %s1320_s26 = scalar_select %p1084_p6, 1, 0 }
   0xf   : > { %p1089_p8 = pnand %p619_p5, %p160_p7  ;;  %s1001_s28 = smov [#allocation6]  }
  0x10   : > { %s175_s29 = sshll.u32 %s1001_s28, 4  ;;  %s1002_s5 = smov [#allocation8]   ;;  %s1093_s29 = int_to_ptr.vmem [resolvable:$true] %s175_s29 }
  0x11   : > { %p745_p9 = pneg %p1089_p8  ;;  %s188_s6 = sshll.u32 %s1002_s5, 4  ;;  %s1104_s6 = int_to_ptr.vmem [resolvable:$true] %s188_s6 }
  0x12   : > { %s827_s9 = scalar_lea.hbm %s1309_s1, 512 }
  0x13   : > { %p1100_p11 = pnand %p745_p9, %p1069_p1  ;;  %p828_p12 = scmp.ne.s32.totalorder %s1309_s1, %s827_s9 }
  0x14   : > { %p834_p5 = scmp.lt.u32.totalorder %s827_s9, %s1309_s1 }
  0x15   : > { %p829_p13 = pneg %p1100_p11 }
  0x17   : > { %p830_p0 = pnand %p829_p13, %p828_p12 }
  0x19   : > { %p831_p3 = pneg %p830_p0 }
  0x1b   : > { %p836_p7 = pnand %p834_p5, %p831_p3 }
  0x1d   : > { %839 = shalt.err (!%p836_p7)
}
  0x1e   : > { %s840_s14 = scalar_lea.vmem %s1093_s29, 512  ;;  %p848_p1 = scmp.lt.s32.totalorder %s1093_s29, %s1093_s29 }
  0x1f   : > { %p841_p9 = scmp.ne.s32.totalorder %s1093_s29, %s840_s14  ;;  %p849_p12 = scmp.lt.s32.totalorder %s840_s14, %s840_s14 }
  0x21   : > { %p843_p10 = pnand %p841_p9, %p829_p13  ;;  %p850_p0 = por %p849_p12, %p848_p1 }
  0x23   : > { %p844_p6 = pneg %p843_p10 }
  0x25   : > { %p851_p4 = pnand %p850_p0, %p844_p6 }
  0x27   : > { %854 = shalt.err (!%p851_p4)
}
  0x28   : > { %s1003_s21 = smov 128   ;;  %s1004_s22 = smov 8  }
  0x29   : > { %748 = dma.hbm_to_vmem [thread:$0]  (!%p1100_p11), %s1309_s1, 512, %s1093_s29, [#allocation7], %s1003_s21, %s1003_s21, %s1004_s22  }
  0x2a   : > { %s855_s9 = scalar_lea.hbm %s1310_s2, 2048 }
  0x2b   : > { %p856_p1 = scmp.ne.s32.totalorder %s1310_s2, %s855_s9  ;;  %p862_p10 = scmp.lt.u32.totalorder %s855_s9, %s1310_s2 }
  0x2d   : > { %p858_p4 = pnand %p856_p1, %p829_p13 }
  0x2f   : > { %p859_p6 = pneg %p858_p4 }
  0x31   : > { %p864_p3 = pnand %p862_p10, %p859_p6 }
  0x33   : > { %867 = shalt.err (!%p864_p3)
}
  0x34   : > { %s868_s29 = scalar_lea.vmem %s1104_s6, 2048  ;;  %p876_p12 = scmp.lt.s32.totalorder %s1104_s6, %s1104_s6 }
  0x35   : > { %p869_p5 = scmp.ne.s32.totalorder %s1104_s6, %s868_s29  ;;  %p877_p0 = scmp.lt.s32.totalorder %s868_s29, %s868_s29 }
  0x37   : > { %p871_p7 = pnand %p869_p5, %p829_p13  ;;  %p878_p1 = por %p877_p0, %p876_p12 }
  0x39   : > { %p872_p9 = pneg %p871_p7 }
  0x3b   : > { %p879_p4 = pnand %p878_p1, %p872_p9 }
  0x3d   : > { %882 = shalt.err (!%p879_p4)
}
  0x3e   : > { %751 = dma.hbm_to_vmem [thread:$0]  (!%p1100_p11), %s1310_s2, 2048, %s1104_s6, [#allocation7], %s1003_s21, %s1003_s21, %s1004_s22  }
  0x3f   : > { %s33_s5 = sadd.s32 1, %s995_s19  ;;  %s42_s7 = sadd.s32 1, %s987_s17 }
  0x40   : > { %p35_p13 = scmp.ge.s32.totalorder %s33_s5, 2  ;;  %p49_p6 = scmp.ne.s32.totalorder %s987_s17, %s983_s16 }
  0x41   : > { %p50_p10 = scmp.eq.s32.totalorder %s999_s20, 0  ;;  %p762_p3 = scmp.lt.s32.totalorder %s999_s20, 2 }
  0x42   : > { %s1336_s5 = smov (%p35_p13, %s33_s5), 0  ;;  %p1168_p7 = por %p1073_p2, %p49_p6 }
  0x43   : > { %p51_p5 = por %p50_p10, %p49_p6  ;;  %s37_s8 = ssub.s32 %s995_s19, %s1336_s5 }
  0x44   : > { %s1323_s30 = scalar_select %p1168_p7, 1, 0 }
  0x45   : > { %s205_s9 = sand.u32 1, %s987_s17   ;;  %p40_p9 = scmp.eq.s32.totalorder %s37_s8, 0 }
  0x46   : > { %s623_s6 = sshll.u32 %s205_s9, 3  ;;  %s624_s21 = sshll.u32 %s995_s19, 7 }
  0x47   : > { %s1177_s22 = scalar_select %p40_p9, %s987_s17, %s42_s7  }
  0x48   : > { %s1182_s12 = scalar_lea.hbm %s1308_s0, %s624_s21  ;;  %s209_s24 = scalar_lea.vmem [#allocation3], %s623_s6 }
  0x49   : > { %s217_s13 = sshll.u32 %s209_s24, 4  ;;  %p1186_p2 = pnand %p762_p3, %p51_p5  ;;  %s1190_s13 = int_to_ptr.vmem [resolvable:$true] %s217_s13 }
  0x4a   : > { %s206_s14 = scalar_lea.sflag [#allocation4], %s205_s9  ;;  %s883_s28 = scalar_lea.hbm %s1182_s12, 128 }
  0x4b   : > { %p884_p11 = scmp.ne.s32.totalorder %s1182_s12, %s883_s28  ;;  %p885_p12 = pneg %p1186_p2 }
  0x4c   : > { %s888_s6 = scalar_lea.hbm %s1308_s0, 256  ;;  %p889_p4 = scmp.lt.u32.totalorder %s1182_s12, %s1308_s0 }
  0x4d   : > { %p886_p0 = pnand %p885_p12, %p884_p11  ;;  %p890_p13 = scmp.lt.u32.totalorder %s888_s6, %s883_s28 }
  0x4e   : > { %p892_p10 = scmp.lt.u32.totalorder %s883_s28, %s1182_s12 }
  0x4f   : > { %p887_p1 = pneg %p886_p0  ;;  %p891_p6 = por %p890_p13, %p889_p4 }
  0x51   : > { %p893_p3 = por %p892_p10, %p891_p6 }
  0x53   : > { %p894_p5 = pnand %p893_p3, %p887_p1 }
  0x55   : > { %897 = shalt.err (!%p894_p5)
}
  0x56   : > { %s898_s9 = scalar_lea.vmem %s1190_s13, 128  ;;  %s1005_s11 = smov [#allocation3]  }
  0x57   : > { %p899_p9 = scmp.ne.s32.totalorder %s1190_s13, %s898_s9  ;;  %s903_s24 = sshll.u32 %s1005_s11, 4  ;;  %s904_s24 = int_to_ptr.vmem [resolvable:$false] %s903_s24 }
  0x58   : > { %s905_s7 = scalar_lea.vmem %s904_s24, 256  ;;  %p906_p7 = scmp.lt.s32.totalorder %s1190_s13, %s904_s24 }
  0x59   : > { %p901_p11 = pnand %p899_p9, %p885_p12  ;;  %p907_p4 = scmp.lt.s32.totalorder %s905_s7, %s898_s9 }
  0x5b   : > { %p902_p0 = pneg %p901_p11  ;;  %p908_p13 = por %p907_p4, %p906_p7 }
  0x5d   : > { %p909_p6 = pnand %p908_p13, %p902_p0 }
  0x5f   : > { %912 = shalt.err (!%p909_p6)
}
  0x60   : > { %755 = dma.hbm_to_vmem [thread:$0]  (!%p1186_p2), %s1182_s12, 128, %s1190_s13, %s206_s14  }
  0x61   : > { %226 = sbr.rel (%p1089_p8) target bundleno = 781 (0x30d), region = 36  ;;  %s1220_s28 = sand.u32 (!%p1089_p8), 1, %s983_s16  }
  0x62   : > { %s626_s8 = sshll.u32 (!%p1089_p8), %s1220_s28, 3  ;;  %s229_s6 = scalar_lea.sflag (!%p1089_p8), [#allocation4], %s1220_s28 }
  0x63   : > { %s232_s21 = scalar_lea.vmem (!%p1089_p8), [#allocation3], %s626_s8  ;;  %p1325_p7 = scmp.ne.s32.totalorder (!%p1089_p8), %s1319_s25, 0 }
  0x68   : > { %966 = dma.done.wait (%p1325_p7), %s229_s6, 128  }
  0x69   : > { %968 = vsyncadd (%p1325_p7), %s229_s6, 4294967168  ;;  %p1326_p2 = scmp.ne.s32.totalorder %s1317_s23, 0 }
  0x6b   : > { %970 = dma.done.wait (%p1326_p2), [#allocation7], 2560  }
  0x6c   : > { %972 = vsyncadd (%p1326_p2), [#allocation7], 4294964736  ;;  %v1006_v0 = vmov 0.0|0.0   ;;  %vm1007_vm0 = vmmov 0   ;;  %v1008_v1 = vmov 0.0   ;;  %v273_v2 = vld [vmem:[#allocation6] sm:$0xff]  ;;  %v358_v9 = vlaneseq }
  0x6d   : > { %703 = vmatprep.subr.bf16.mxu0 %v1006_v0  ;;  %665 = vmatprep.mubr.msk.f32.mxu0 %vm1007_vm0, %v1008_v1  ;;  %v274_v3 = vld [vmem:[#allocation6 + $0x8] sm:$0xff]  ;;  %v275_v4 = vld [vmem:[#allocation6 + $0x10] sm:$0xff]  ;;  %v276_v6 = vld [vmem:[#allocation6 + $0x18] sm:$0xff]  ;;  %vm277_vm1 = vcmask 261120   ;;  %s632_s27 = sshll.u32 %s991_s18, 7  ;;  %s264_s12 = scalar_lea.vmem [#allocation9], %s626_s8 }
  0x6e   : > { %709 = vmatprep.subr.bf16.mxu1 %v1006_v0  ;;  %700 = vmatprep.mubr.msk.f32.mxu1 %vm1007_vm0, %v1008_v1  ;;  %v704_v5 = vpack.c.bf16 %v274_v3, %v273_v2  ;;  %v707_v7 = vpack.c.bf16 %v276_v6, %v275_v4  ;;  %v272_v8 = vld [vmem:[%s232_s21] sm:$0xff]  ;;  %v359_v10 = vshrl.u32 %v358_v9, 7  ;;  %v387_v13 = vld [vmem:[#allocation8] sm:$0xff]  ;;  %v388_v14 = vld [vmem:[#allocation8 + $0x8] sm:$0xff]  ;;  %s517_s13 = sshll.u32 %s264_s12, 4  ;;  %s1259_s10 = scalar_lea.hbm %s1312_s4, %s632_s27  ;;  %s1261_s13 = int_to_ptr.vmem [resolvable:$true] %s517_s13 }
  0x6f   : > { %v389_v15 = vld [vmem:[#allocation8 + $0x10] sm:$0xff]  ;;  %v710_v17 = vpack.c.bf16 %v388_v14, %v387_v13  ;;  %v390_v18 = vld [vmem:[#allocation8 + $0x18] sm:$0xff]  ;;  %v391_v22 = vld [vmem:[#allocation8 + $0x20] sm:$0xff]  ;;  %s504_s9 = scalar_lea.sflag [#allocation5], %s1220_s28  ;;  %s913_s18 = scalar_lea.vmem %s1261_s13, 128 }
  0x70   : > { %705 = vmatpush3.bf16.msra.mxu0 %v704_v5  ;;  %v494_v11 = vsub.s32 2, %v359_v10  ;;  %v499_v12 = vsub.s32 3, %v359_v10  ;;  %v356_v16 = vld [vmem:[%s1311_s3] sm:$0xf]  ;;  %v713_v21 = vpack.c.bf16 %v390_v18, %v389_v15  ;;  %v392_v23 = vld [vmem:[#allocation8 + $0x28] sm:$0xff]  ;;  %v394_v26 = vld [vmem:[#allocation8 + $0x38] sm:$0xff]  ;;  %p914_p8 = scmp.ne.s32.totalorder %s1261_s13, %s913_s18 }
  0x71   : > { %706 = vmatprep.subr.bf16.mxu0 %v1006_v0  ;;  %711 = vmatpush3.bf16.msra.mxu1 %v710_v17  ;;  %v716_v24 = vpack.c.bf16 %v392_v23, %v391_v22  ;;  %v393_v25 = vld [vmem:[#allocation8 + $0x30] sm:$0xff]  ;;  %v395_v28 = vld [vmem:[#allocation8 + $0x40] sm:$0xff]  ;;  %v396_v29 = vld [vmem:[#allocation8 + $0x48] sm:$0xff]  ;;  %v405_v40 = vsub.s32 1, %v359_v10  ;;  %v360_v42 = vsub.s32 0, %v359_v10  ;;  %p1327_p12 = scmp.ne.s32.totalorder %s1323_s30, 0 }
  0x72   : > { %v1240_v19 = vrot.slane %v356_v16, %v494_v11  ;;  %v1242_v20 = vrot.slane %v356_v16, %v499_v12  ;;  %712 = vmatprep.subr.bf16.mxu1 %v1006_v0  ;;  %v719_v27 = vpack.c.bf16 %v394_v26, %v393_v25  ;;  %v722_v30 = vpack.c.bf16 %v396_v29, %v395_v28  ;;  %v397_v31 = vld [vmem:[#allocation8 + $0x50] sm:$0xff]  ;;  %v398_v32 = vld [vmem:[#allocation8 + $0x58] sm:$0xff]  ;;  %v399_v34 = vld [vmem:[#allocation8 + $0x60] sm:$0xff]  ;;  %s1009_s11 = smov [#allocation9]  }
  0x73   : > { %v725_v33 = vpack.c.bf16 %v398_v32, %v397_v31  ;;  %v400_v35 = vld [vmem:[#allocation8 + $0x68] sm:$0xff]  ;;  %v401_v37 = vld [vmem:[#allocation8 + $0x70] sm:$0xff]  ;;  %v402_v38 = vld [vmem:[#allocation8 + $0x78] sm:$0xff]  ;;  %v406_v41 = vrot.slane %v356_v16, %v405_v40  ;;  %v361_v43 = vrot.slane %v356_v16, %v360_v42  ;;  %p915_p1 = pnand %p914_p8, %p1327_p12  ;;  %s917_s24 = sshll.u32 %s1009_s11, 4  ;;  %s918_s24 = int_to_ptr.vmem [resolvable:$false] %s917_s24 }
  0x74   : > { %708 = vmatpush3.bf16.msra.mxu0 %v707_v7  ;;  %v728_v36 = vpack.c.bf16 %v400_v35, %v399_v34  ;;  %v731_v39 = vpack.c.bf16 %v402_v38, %v401_v37  ;;  %s919_s7 = scalar_lea.vmem %s918_s24, 256  ;;  %p920_p3 = scmp.lt.s32.totalorder %s1261_s13, %s918_s24 }
  0x75   : > { %714 = vmatpush3.bf16.msra.mxu1 %v713_v21  ;;  %p916_p10 = pneg %p915_p1  ;;  %p921_p5 = scmp.lt.s32.totalorder %s919_s7, %s913_s18 }
  0x76   : > { %715 = vmatprep.subr.bf16.mxu1 %v1006_v0 }
  0x77   : > { %666 = vmatmul.mubr.msk.f32.vlgmr.msra.gmra.mrb[0].mxu0 %vm277_vm1, %v272_v8  ;;  %p922_p9 = por %p921_p5, %p920_p3 }
  0x79   : > { %717 = vmatpush3.bf16.msra.mxu1 %v716_v24  ;;  %p923_p11 = pnand %p922_p9, %p916_p10 }
  0x7a   : > { %718 = vmatprep.subr.bf16.mxu1 %v1006_v0 }
  0x7d   : > { %720 = vmatpush3.bf16.msra.mxu1 %v719_v27 }
  0x7e   : > { %721 = vmatprep.subr.bf16.mxu1 %v1006_v0 }
  0x81   : > { %723 = vmatpush3.bf16.msra.mxu1 %v722_v30 }
  0x82   : > { %724 = vmatprep.subr.bf16.mxu1 %v1006_v0 }
  0x85   : > { %726 = vmatpush3.bf16.msra.mxu1 %v725_v33 }
  0x86   : > { %727 = vmatprep.subr.bf16.mxu1 %v1006_v0 }
  0x89   : > { %729 = vmatpush3.bf16.msra.mxu1 %v728_v36 }
  0x8a   : > { %730 = vmatprep.subr.bf16.mxu1 %v1006_v0 }
  0x8d   : > { %732 = vmatpush3.bf16.msra.mxu1 %v731_v39 }
 0x14a   : > { %v347_v44 = vpop.f32.mrb[0].mxu0 }
 0x14b   : > { %v362_v45 = vadd.f32 %v361_v43, %v347_v44  ;;  %v667_v46 = vpop.f32.mrb[1].mxu0 }
 0x14d   : > { %v363_v47 = vand.u32 2147483647, %v362_v45 }
 0x14f   : > { %v364_v48 = vmul.f32 0.70710677, %v363_v47 }
 0x151   : > { %v365_v49 = vmul.f32 0.3275911, %v364_v48  ;;  %v378_v51 = vsub.f32 0.0, %v364_v48 }
 0x153   : > { %v366_v50 = vadd.f32 1.0, %v365_v49  ;;  %v379_v53 = vmul.f32 %v378_v51, %v364_v48 }
 0x155   : > { %821 = vrcp.f32 %v366_v50  ;;  %v380_v56 = vmul.f32 1.442695, %v379_v53 }
 0x157   : > { %823 = vpow2.f32 %v380_v56 }
 0x15f   : > { %v822_v52 = vpop.eup %821 }
 0x160   : > { %v369_v54 = vmul.f32 1.0614054, %v822_v52 }
 0x161   : > { %v824_v0 = vpop.eup %823 }
 0x162   : > { %v370_v55 = vadd.f32 -1.4531521, %v369_v54 }
 0x164   : > { %v371_v57 = vmul.f32 %v822_v52, %v370_v55 }
 0x166   : > { %v372_v58 = vadd.f32 1.4214138, %v371_v57 }
 0x168   : > { %v373_v59 = vmul.f32 %v822_v52, %v372_v58 }
 0x16a   : > { %v374_v60 = vadd.f32 -0.28449672, %v373_v59 }
 0x16c   : > { %v375_v61 = vmul.f32 %v822_v52, %v374_v60 }
 0x16e   : > { %v376_v62 = vadd.f32 0.2548296, %v375_v61 }
 0x170   : > { %v377_v63 = vmul.f32 %v822_v52, %v376_v62 }
 0x172   : > { %v382_v1 = vmul.f32 %v824_v0, %v377_v63 }
 0x174   : > { %v383_v2 = vsub.f32 1.0, %v382_v1 }
 0x176   : > { %v384_v3 = vmul.f32 %v383_v2, %v363_v47 }
 0x178   : > { %v385_v4 = vadd.f32 %v384_v3, %v362_v45 }
 0x17a   : > { %v386_v5 = vmul.f32 0.5, %v385_v4 }
 0x17c   : > { %701 = vmatmul.mubr.f32.vlgmr.msra.gmra.mrb[0].mxu1 %v386_v5 }
 0x24f   : > { %v473_v6 = vpop.f32.mrb[0].mxu1 }
 0x250   : > { %v474_v7 = vadd.f32 %v473_v6, %v406_v41  ;;  %v702_v8 = vpop.f32.mrb[1].mxu1 }
 0x252   : > { %v477_v9 = vadd.f32 %v474_v7, %v362_v45 }
 0x254   : > { %478 = vadd.xlane.f32.xlu0 %v477_v9  ;;  %v481_v10 = vmul.f32 %v477_v9, %v477_v9 }
 0x258   : > { %482 = vadd.xlane.f32.xlu0 %v481_v10 }
 0x2e1   : > { %v479_v11 = vpop.xlane.xlu0 %478 }
 0x2e2   : > { %v480_v12 = vmul.f32 0.015625, %v479_v11 }
 0x2e4   : > { %v485_v14 = vmul.f32 %v480_v12, %v480_v12  ;;  %v488_v21 = vsub.f32 %v477_v9, %v480_v12 }
 0x2e5   : > { %v483_v13 = vpop.xlane.xlu0 %482 }
 0x2e6   : > { %v484_v15 = vmul.f32 0.015625, %v483_v13 }
 0x2e8   : > { %v486_v16 = vsub.f32 %v484_v15, %v485_v14 }
 0x2ea   : > { %v487_v17 = vmax.f32 %v486_v16, 0.0 }
 0x2ec   : > { %v489_v18 = vadd.f32 1e-05, %v487_v17 }
 0x2ee   : > { %825 = vrsqrt.f32 %v489_v18 }
 0x2f8   : > { %v826_v22 = vpop.eup %825 }
 0x2f9   : > { %v491_v23 = vmul.f32 %v826_v22, %v488_v21 }
 0x2fb   : > { %v496_v24 = vmul.f32 %v1240_v19, %v491_v23 }
 0x2fd   : > { %v501_v25 = vadd.f32 %v1242_v20, %v496_v24 }
 0x2ff   : > { %502 = vst [vmem:[%s264_s12] sm:$0xff] %v501_v25 }
 0x300   : > { %926 = shalt.err (!%p923_p11)
}
 0x301   : > { %s927_s28 = scalar_lea.hbm %s1259_s10, 128  ;;  %s931_s21 = scalar_lea.hbm %s1312_s4, 256 }
 0x302   : > { %p928_p0 = scmp.ne.s32.totalorder %s1259_s10, %s927_s28  ;;  %p932_p6 = scmp.lt.u32.totalorder %s1259_s10, %s1312_s4 }
 0x303   : > { %p933_p7 = scmp.lt.u32.totalorder %s931_s21, %s927_s28  ;;  %p935_p8 = scmp.lt.u32.totalorder %s927_s28, %s1259_s10 }
 0x304   : > { %p929_p4 = pnand %p928_p0, %p1327_p12 }
 0x305   : > { %p934_p2 = por %p933_p7, %p932_p6 }
 0x306   : > { %p930_p13 = pneg %p929_p4 }
 0x307   : > { %p936_p1 = por %p935_p8, %p934_p2 }
 0x309   : > { %p937_p10 = pnand %p936_p1, %p930_p13 }
 0x30b   : > { %940 = shalt.err (!%p937_p10)
}
 0x30c   : > { %743 = dma.vmem_to_hbm [thread:$0]  (%p1327_p12), %s1261_s13, 128, %s1259_s10, %s504_s9  }
 0x30d PF: > { %s529_s27 = sand.u32 1, %s979_s15   ;;  %p1328_p3 = scmp.ne.s32.totalorder %s1320_s26, 0 }
 0x30e   : > { %p1329_p5 = scmp.ge.s32.totalorder %s999_s20, 2  ;;  %s530_s12 = scalar_lea.sflag [#allocation5], %s529_s27 }
 0x310   : > { %p757_p9 = pnand %p1329_p5, %p1328_p3 }
 0x312   : > { %974 = dma.done.wait (!%p757_p9), %s530_s12, 128  }
 0x313   : > { %976 = vsyncadd (!%p757_p9), %s530_s12, 4294967168  ;;  %s21_s20 = sadd.s32 1, %s999_s20   ;;  %s1330_s15 = smov %s983_s16 }
 0x314   : > { %p18_p11 = scmp.ge.s32.totalorder %s21_s20, 4   ;;  %s1331_s16 = smov %s987_s17 }
 0x315   : > { %s1332_s17 = smov %s1177_s22  ;;  %s1333_s18 = smov %s995_s19 }
 0x316   : > { %s1334_s19 = smov %s1336_s5  ;;  %20 = sbr.rel (!%p18_p11) target bundleno = 7 (0x7), region = 98 }
 0x31d   :  { %535 = vsyncpa [#allocation4], 1 }
 0x31e   :  { %537 = vsyncpa [#allocation4 + $0x1], 1 }
 0x31f   :  { %538 = vsyncpa [#allocation7], 1 }
 0x320   :  { %539 = vsyncpa [#allocation5], 1 }
 0x321   :  { %541 = vsyncpa [#allocation5 + $0x1], 1 }

</bundles_post_ra>
